<compile_context>
chip_gen: v5e
topology: v5e:2x2
jax: 0.10.0
libtpu: 0.0.40
codegen_flags: <defaults>
</compile_context>

<pallas_src>
import math

import jax
import jax.numpy as jnp
from jax.experimental import pallas as pl
from jax.experimental.pallas import tpu as pltpu


def _round_up(x: int, m: int) -> int:
    return ((x + m - 1) // m) * m


def _gcn_fused_kernel(adj_ref, x_ref, w_ref, b_ref, o_ref):
    """One (row-block i, reduction-block k) step of out = adj @ (x @ w) + b.

    grid = (M/tm, K/tk); axis 0 is "parallel", axis 1 ("arbitrary") is the
    reduction over adj columns / x rows.  The output block index map ignores
    k, so o_ref stays VMEM-resident across the whole reduction and doubles as
    the f32 accumulator.
    """
    k = pl.program_id(1)

    @pl.when(k == 0)
    def _():
        # Fold the bias into the accumulator init (no epilogue add).
        o_ref[...] = jnp.broadcast_to(
            b_ref[...].astype(jnp.float32), o_ref.shape
        ).astype(o_ref.dtype)

    # support tile: (tk, F_in) @ (F_in, F_out).  weight has a constant
    # index_map so it is DMA'd once and stays VMEM-resident.
    support = jnp.dot(x_ref[...], w_ref[...],
                      preferred_element_type=jnp.float32)

    # out tile: (tm, tk) @ (tk, F_out), accumulated in f32 on the MXU.
    o_ref[...] += jnp.dot(adj_ref[...], support.astype(adj_ref.dtype),
                          preferred_element_type=jnp.float32)


def graph_convolution(x, adj, weight, bias=None, *, use_bf16_operands=False):
    """Pallas equivalent of GraphConvolution.forward(input, adj).

    x:      (N_nodes, F_in)
    adj:    (N_nodes, N_nodes)
    weight: (F_in, F_out)
    bias:   (F_out,) or None
    """
    n_nodes, f_in = x.shape
    assert adj.shape == (n_nodes, n_nodes), adj.shape
    assert weight.shape[0] == f_in, (weight.shape, f_in)
    f_out = weight.shape[1]

    out_dtype = jnp.float32  # module uses FloatTensor parameters / outputs

    if use_bf16_operands:
        # Halves the dominant HBM stream (adj); accumulation stays f32.
        x = x.astype(jnp.bfloat16)
        adj = adj.astype(jnp.bfloat16)
        weight = weight.astype(jnp.bfloat16)

    M = K = n_nodes
    item = jnp.dtype(adj.dtype).itemsize

    # ---------------- tile selection ------------------------------------
    # F_in / F_out stay whole per block (no j grid axis -> adj streamed once).
    TM_MAX, TK_MAX = 1024, 2048
    VMEM_BUDGET = 40 * 1024 * 1024  # double-buffered working set, < v7x 64 MiB

    def vmem_need(tm, tk):
        # double-buffered adj/x input blocks + f32 output block (x2)
        # + resident weight/bias.
        return (item * (2 * (tm * tk + tk * f_in) + 2 * f_in * f_out + 2 * f_out)
                + 4 * 2 * tm * f_out)

    tm_max, tk_max = TM_MAX, TK_MAX
    while vmem_need(tm_max, tk_max) > VMEM_BUDGET and tk_max > 512:
        tk_max //= 2
    while vmem_need(tm_max, tk_max) > VMEM_BUDGET and tm_max > 64:
        tm_max //= 2

    def pick(dim, max_tile, align):
        """Pick (tile, padded_dim) minimizing padding; full-extent if small."""
        if dim <= max_tile:
            return dim, dim  # full-extent block: no padding, no (8,128) rule
        nblk = pl.cdiv(dim, max_tile)
        tile = _round_up(pl.cdiv(dim, nblk), align)
        return tile, tile * nblk

    tm, m_pad = pick(M, tm_max, 8)
    tk, k_pad = pick(K, tk_max, 128)

    # v7x has 2 TensorCores sharded over "parallel" axes: keep >= 2 row
    # blocks when that costs no padding (tm stays a multiple of 8).
    if m_pad == M == tm and M % 16 == 0 and M >= 16:
        tm = M // 2

    gi, gk = m_pad // tm, k_pad // tk

    # ---------------- operand prep (pad only when strictly needed) ------
    adj_p = adj
    if (m_pad, k_pad) != (M, K):
        # TODO(synk): for very large non-divisible graphs a masked ragged last
        # block would avoid this extra HBM copy of adj.
        adj_p = jnp.pad(adj, ((0, m_pad - M), (0, k_pad - K)))
    x_p = x if k_pad == K else jnp.pad(x, ((0, k_pad - K), (0, 0)))

    if bias is None:
        bias_p = jnp.zeros((1, f_out), dtype=jnp.float32)
    else:
        bias_p = bias.reshape(1, f_out).astype(jnp.float32)

    # ---------------- cost estimate (includes x re-reads per row block) -
    cost = pl.CostEstimate(
        flops=2 * m_pad * k_pad * f_out + 2 * gi * k_pad * f_in * f_out,
        transcendentals=0,
        bytes_accessed=(item * (m_pad * k_pad            # adj: read once
                                + gi * k_pad * f_in      # x: once per row blk
                                + f_in * f_out + f_out)  # weight + bias
                        + 4 * m_pad * f_out),            # f32 output write
    )

    out = pl.pallas_call(
        _gcn_fused_kernel,
        out_shape=jax.ShapeDtypeStruct((m_pad, f_out), out_dtype),
        grid_spec=pltpu.PrefetchScalarGridSpec(
            num_scalar_prefetch=0,
            grid=(gi, gk),
            in_specs=[
                pl.BlockSpec((tm, tk), lambda i, k: (i, k)),       # adj
                pl.BlockSpec((tk, f_in), lambda i, k: (k, 0)),     # x
                pl.BlockSpec((f_in, f_out), lambda i, k: (0, 0)),  # weight
                pl.BlockSpec((1, f_out), lambda i, k: (0, 0)),     # bias
            ],
            out_specs=pl.BlockSpec((tm, f_out), lambda i, k: (i, 0)),
        ),
        compiler_params=pltpu.CompilerParams(
            dimension_semantics=("parallel", "arbitrary"),
            vmem_limit_bytes=48 * 1024 * 1024,   # > 32 MiB default, < v7x 64 MiB
        ),
        cost_estimate=cost,
    )(adj_p, x_p, weight, bias_p)

    return out if m_pad == M else out[:M]


if __name__ == "__main__":
    key = jax.random.PRNGKey(0)
    k_x, k_adj, k_w, k_b = jax.random.split(key, 4)

    # Small GCN-shaped problem: 16 nodes, in_features=8, out_features=32.
    n_nodes, in_features, out_features = 16, 8, 32

    x = jax.random.normal(k_x, (n_nodes, in_features), dtype=jnp.float32)
    adj = jax.random.uniform(k_adj, (n_nodes, n_nodes), dtype=jnp.float32)

    # Parameter init mirroring reset_parameters(): U(-stdv, stdv).
    stdv = 1.0 / math.sqrt(out_features)
    weight = jax.random.uniform(
        k_w, (in_features, out_features), minval=-stdv, maxval=stdv,
        dtype=jnp.float32)
    bias = jax.random.uniform(
        k_b, (out_features,), minval=-stdv, maxval=stdv, dtype=jnp.float32)

    y = graph_convolution(x, adj, weight, bias)
    y = jax.block_until_ready(y)

    # Reference: adj @ (x @ weight) + bias.
    y_ref = adj @ (x @ weight) + bias
    assert y.shape == y_ref.shape == (n_nodes, out_features)
    assert jnp.allclose(y, y_ref, atol=1e-4, rtol=1e-4), float(
        jnp.max(jnp.abs(y - y_ref)))

    # Also exercise the bias=None path.
    y_nb = jax.block_until_ready(graph_convolution(x, adj, weight, None))
    assert jnp.allclose(y_nb, adj @ (x @ weight), atol=1e-4, rtol=1e-4)

    print("KERNEL_OK")
</pallas_src>

<mosaic_0001>
module attributes {stable_mosaic.version = 11 : i64} {
  func.func @_gcn_fused_kernel(%arg0: i32, %arg1: i32, %arg2: memref<8x16xf32, #tpu.memory_space<vmem>>, %arg3: memref<16x8xf32, #tpu.memory_space<vmem>>, %arg4: memref<8x32xf32, #tpu.memory_space<vmem>>, %arg5: memref<1x32xf32, #tpu.memory_space<vmem>>, %arg6: memref<8x32xf32, #tpu.memory_space<vmem>>) attributes {dimension_semantics = [#tpu.dimension_semantics<parallel>, #tpu.dimension_semantics<arbitrary>], iteration_bounds = array<i64: 2, 1>, scalar_prefetch = 0 : i64, scratch_operands = 0 : i64, tpu.core_type = #tpu.core_type<tc>, window_params = [{transform_indices = @transform_0, window_bounds = array<i64: 8, 16>}, {transform_indices = @transform_1, window_bounds = array<i64: 16, 8>}, {pipeline_mode = #tpu.pipeline_mode<synchronous>, transform_indices = @transform_2, window_bounds = array<i64: 8, 32>}, {pipeline_mode = #tpu.pipeline_mode<synchronous>, transform_indices = @transform_3, window_bounds = array<i64: 1, 32>}, {transform_indices = @transform_4, window_bounds = array<i64: 8, 32>}]} {
    %c0_i32 = arith.constant 0 : i32
    %0 = arith.cmpi eq, %arg1, %c0_i32 : i32
    %1 = arith.extui %0 : i1 to i32
    %c0_i32_0 = arith.constant 0 : i32
    %2 = arith.cmpi ne, %1, %c0_i32_0 : i32
    scf.if %2 {
      %c0_11 = arith.constant 0 : index
      %c0_12 = arith.constant 0 : index
      %11 = vector.load %arg5[%c0_11, %c0_12] : memref<1x32xf32, #tpu.memory_space<vmem>>, vector<1x32xf32>
      %12 = vector.shape_cast %11 : vector<1x32xf32> to vector<1x32xf32>
      %13 = vector.broadcast %12 : vector<1x32xf32> to vector<8x32xf32>
      %c0_13 = arith.constant 0 : index
      %c0_14 = arith.constant 0 : index
      %14 = vector.load %arg6[%c0_13, %c0_14] : memref<8x32xf32, #tpu.memory_space<vmem>>, vector<8x32xf32>
      tpu.vector_store %arg6[%c0_13, %c0_14], %13 {strides = array<i32>} : memref<8x32xf32, #tpu.memory_space<vmem>>, vector<8x32xf32>,
    } else {
    }
    %c0 = arith.constant 0 : index
    %c0_1 = arith.constant 0 : index
    %3 = vector.load %arg3[%c0, %c0_1] : memref<16x8xf32, #tpu.memory_space<vmem>>, vector<16x8xf32>
    %c0_2 = arith.constant 0 : index
    %c0_3 = arith.constant 0 : index
    %4 = vector.load %arg4[%c0_2, %c0_3] : memref<8x32xf32, #tpu.memory_space<vmem>>, vector<8x32xf32>
    %cst = arith.constant dense<0.000000e+00> : vector<16x32xf32>
    %5 = tpu.matmul %3, %4, %cst {dimension_numbers = #tpu.dot_dimension_numbers<[1], [0], [0], [1], [0, 0, 1, 1], [], []>} : vector<16x8xf32>, vector<8x32xf32>, vector<16x32xf32> -> vector<16x32xf32>
    %c0_4 = arith.constant 0 : index
    %c0_5 = arith.constant 0 : index
    %6 = vector.load %arg6[%c0_4, %c0_5] : memref<8x32xf32, #tpu.memory_space<vmem>>, vector<8x32xf32>
    %c0_6 = arith.constant 0 : index
    %c0_7 = arith.constant 0 : index
    %7 = vector.load %arg2[%c0_6, %c0_7] : memref<8x16xf32, #tpu.memory_space<vmem>>, vector<8x16xf32>
    %cst_8 = arith.constant dense<0.000000e+00> : vector<8x32xf32>
    %8 = tpu.matmul %7, %5, %cst_8 {dimension_numbers = #tpu.dot_dimension_numbers<[1], [0], [0], [1], [0, 0, 1, 1], [], []>} : vector<8x16xf32>, vector<16x32xf32>, vector<8x32xf32> -> vector<8x32xf32>
    %9 = arith.addf %6, %8 : vector<8x32xf32>
    %c0_9 = arith.constant 0 : index
    %c0_10 = arith.constant 0 : index
    %10 = vector.load %arg6[%c0_9, %c0_10] : memref<8x32xf32, #tpu.memory_space<vmem>>, vector<8x32xf32>
    tpu.vector_store %arg6[%c0_9, %c0_10], %9 {strides = array<i32>} : memref<8x32xf32, #tpu.memory_space<vmem>>, vector<8x32xf32>,
    return
  }
  func.func @transform_0(%arg0: i32, %arg1: i32) -> (i32, i32) {
    %c0_i32 = arith.constant 0 : i32
    return %arg0, %arg1 : i32, i32
  }
  func.func @transform_1(%arg0: i32, %arg1: i32) -> (i32, i32) {
    %c0_i32 = arith.constant 0 : i32
    %c0_i32_0 = arith.constant 0 : i32
    return %arg1, %c0_i32 : i32, i32
  }
  func.func @transform_2(%arg0: i32, %arg1: i32) -> (i32, i32) {
    %c0_i32 = arith.constant 0 : i32
    %c0_i32_0 = arith.constant 0 : i32
    %c0_i32_1 = arith.constant 0 : i32
    return %c0_i32, %c0_i32_0 : i32, i32
  }
  func.func @transform_3(%arg0: i32, %arg1: i32) -> (i32, i32) {
    %c0_i32 = arith.constant 0 : i32
    %c0_i32_0 = arith.constant 0 : i32
    %c0_i32_1 = arith.constant 0 : i32
    return %c0_i32, %c0_i32_0 : i32, i32
  }
  func.func @transform_4(%arg0: i32, %arg1: i32) -> (i32, i32) {
    %c0_i32 = arith.constant 0 : i32
    %c0_i32_0 = arith.constant 0 : i32
    return %arg0, %c0_i32 : i32, i32
  }
}

</mosaic_0001>

<bundles_post_ra>
// kernel: tpu_custom_call.1
= control target key start
LH: loop header
LB: loop body
LE: loop exit
PB: predicated region body
PF: predicated region fallthrough
CT: control target
= control target key end

     0   :  { %9 = vsyncpa [#allocation3], 0  ;;  %s699_s0 = inlined_call_operand.vmem [shape: f32[16,16], index: 0, kind: input, shape index: {}]   ;;  %s700_s1 = inlined_call_operand.vmem [shape: f32[16,8], index: 1, kind: input, shape index: {}]   ;;  %s701_s2 = inlined_call_operand.vmem [shape: f32[8,32], index: 2, kind: input, shape index: {}]   ;;  %s702_s3 = inlined_call_operand.vmem [shape: f32[1,32], index: 3, kind: input, shape index: {}]   ;;  %s703_s4 = inlined_call_operand.hbm [shape: f32[16,32], index: 4, kind: output, shape index: {}]  }
   0x1   :  { %11 = vsyncpa [#allocation3 + $0x1], 0  ;;  %s588_s15 = smov 0   ;;  %s590_s16 = smov 0  }
   0x2   :  { %s592_s17 = smov 0   ;;  %s594_s18 = smov 0  }
   0x3   :  { %s596_s19 = smov 0   ;;  %s598_s20 = smov 0  }
   0x4 LB: > { %s411_s21 = sadd.s32 4294967295, %s561_s20   ;;  %s412_s22 = sadd.s32 4294967294, %s561_s20   ;;  %s561_s20 = sphi %s598_s20, %s17_s20   ;;  %s557_s19 = sphi %s596_s19, %s710_s19   ;;  %s553_s18 = sphi %s594_s18, %s709_s18   ;;  %s549_s17 = sphi %s592_s17, %s708_s17   ;;  %s545_s16 = sphi %s590_s16, %s707_s16   ;;  %s541_s15 = sphi %s588_s15, %s706_s15  }
   0x5   : > { %s29_s23 = sadd.s32 1, %s557_s19  ;;  %s132_s24 = sadd.s32 1, %s549_s17 }
   0x6   : > { %p31_p0 = scmp.ge.s32.totalorder %s29_s23, 2  ;;  %p142_p1 = scmp.ne.s32.totalorder %s549_s17, %s545_s16 }
   0x7   : > { %p143_p2 = scmp.eq.s32.totalorder %s411_s21, 1  ;;  %p148_p3 = scmp.ne.s32.totalorder %s545_s16, %s541_s15 }
   0x8   : > { %s712_s23 = smov (%p31_p0, %s29_s23), 0  ;;  %p149_p5 = scmp.eq.s32.totalorder %s412_s22, 1 }
   0x9   : > { %p628_p4 = por %p143_p2, %p142_p1  ;;  %s129_s26 = ssub.s32 %s557_s19, %s712_s23 }
   0xa   : > { %p416_p6 = scmp.ge.s32.totalorder %s561_s20, 1  ;;  %p130_p7 = scmp.eq.s32.totalorder %s129_s26, 0 }
   0xb   : > { %p635_p8 = por %p149_p5, %p148_p3  ;;  %p192_p9 = scmp.lt.s32.totalorder %s561_s20, 3 }
   0xc   : > { %s641_s28 = scalar_select %p130_p7, %s549_s17, %s132_s24  }
   0xd   : > { %p193_p10 = pnand %p416_p6, %p192_p9 }
   0xe   : > { %s222_s9 = sand.u32 (!%p193_p10), 1, %s545_s16   ;;  %p225_p11 = scmp.lt.s32.totalorder (!%p193_p10), %s553_s18, 1 }
   0xf   : > { %196 = sbr.rel (%p193_p10) target bundleno = 288 (0x120), region = 36  ;;  %s417_s10 = sshll.u32 (!%p193_p10), %s222_s9, 3 }
  0x10   : > { %s224_s13 = scalar_lea.vmem (!%p193_p10), [#allocation2], %s417_s10  ;;  %s423_s29 = sshll.u32 (!%p193_p10), %s553_s18, 3 }
  0x11   : > { %s321_s6 = scalar_lea.hbm (!%p193_p10), %s703_s4, %s423_s29  ;;  %s323_s7 = sshll.u32 (!%p193_p10), %s224_s13, 4  ;;  %s324_s7 = int_to_ptr.vmem [resolvable:$true] %s323_s7 }
  0x12   : > { %s325_s8 = sshll.u32 (!%p193_p10), %s321_s6, 4  ;;  %s311_s10 = scalar_lea.sflag (!%p193_p10), [#allocation3], %s222_s9  ;;  %s326_s8 = int_to_ptr.hbm [resolvable:$true] %s325_s8 }
  0x13   : > { %s497_s11 = sshra.s32 (!%p193_p10), %s326_s8, 4  ;;  %s498_s11 = int_to_ptr.hbm [resolvable:$true] %s497_s11 }
  0x14   : > { %v250_v0 = vld [vmem:[%s701_s2] sm:$0xff]  ;;  %v249_v1 = vld [vmem:[%s700_s1 + $0x8] sm:$0xff]  ;;  %vm251_vm0 = vcmask 64512   ;;  %vm246_vm1 = vcmask 261120   ;;  %s226_s14 = scalar_select %p225_p11, %s553_s18, 1  ;;  %vm283_vm2 = vcmask 130048  }
  0x15   : > { %v248_v2 = vld [vmem:[%s700_s1] sm:$0xff]  ;;  %426 = vmatpush.msra.mxu2 %v250_v0  ;;  %273 = vmatpush.msra.mxu0 %v250_v0  ;;  %s499_s12 = scalar_lea.hbm %s498_s11, 8  ;;  %p504_p1 = scmp.lt.s32.totalorder %s498_s11, %s703_s4 }
  0x16   : > { %420 = vmatmul.msk.f32.vlgmr.msra.gmra.mxu2 %vm251_vm0, %v249_v1  ;;  %419 = vmatmul.msk.f32.vlgmr.msra.gmra.mxu0 %vm251_vm0, %v248_v2  ;;  %v482_v3 = vld [vmem:[%s702_s3] ss:$0 sm:$0xff]  ;;  %s418_s21 = sshll.u32 %s226_s14, 3  ;;  %p500_p12 = scmp.ne.s32.totalorder %s498_s11, %s499_s12 }
  0x17   : > { %247 = vst.msk [vmem:[%s224_s13] sm:$0xff] %vm246_vm1, %v482_v3  ;;  %s231_s26 = scalar_lea.vmem %s699_s0, %s418_s21  ;;  %s503_s21 = scalar_lea.hbm %s703_s4, 16 }
  0x18   : > { %v282_v6 = vld [vmem:[%s231_s26] sm:$0xff]  ;;  %p501_p13 = pnand %p500_p12, %p628_p4  ;;  %p505_p2 = scmp.lt.s32.totalorder %s503_s21, %s499_s12 }
  0x1a   : > { %p502_p0 = pneg %p501_p13  ;;  %p506_p3 = por %p505_p2, %p504_p1 }
  0x1c   : > { %p507_p5 = pnand %p506_p3, %p502_p0 }
  0x1e   : > { %v281_v7 = vld [vmem:[%s224_s13] sm:$0xff] }
  0x93   : > { %v275_v5 = vpop.f32.mrf.mxu0 }
  0x99   : > { %v278_v4 = vpop.f32.mrf.mxu2 }
  0x9a   : > { %301 = vmatpush.msra.mxu1 %v278_v4 }
  0x9c   : > { %302 = vmatpush.msra.mxu1 %v275_v5 }
  0x9d   : > { %421 = vmatmul.msk.f32.vlgmr.msra.gmra.mxu1 %vm283_vm2, %v282_v6 }
 0x11a   : > { %v304_v8 = vpop.f32.mrf.mxu1 }
 0x11b   : > { %v307_v9 = vadd.f32 %v304_v8, %v281_v7 }
 0x11d   : > { %309 = vst.msk [vmem:[%s224_s13] sm:$0xff] %vm246_vm1, %v307_v9 }
 0x11e   : > { %510 = shalt.err (!%p507_p5)
}
 0x11f   : > { %427 = dma.vmem_to_hbm [thread:$0]  (%p628_p4), %s324_s7, 128, %s326_s8, %s311_s10  }
 0x120 PF: > { %p433_p6 = scmp.ge.s32.totalorder %s561_s20, 2  ;;  %s337_s9 = sand.u32 1, %s541_s15  }
 0x121   : > { %s338_s13 = scalar_lea.sflag [#allocation3], %s337_s9 }
 0x122   : > { %p430_p7 = pnand %p433_p6, %p635_p8 }
 0x124   : > { %p431_p9 = pneg %p430_p7 }
 0x126   : > { %536 = dma.done.wait (%p431_p9), %s338_s13, 128  }
 0x127   : > { %538 = vsyncadd (%p431_p9), %s338_s13, 4294967168  ;;  %s17_s20 = sadd.s32 1, %s561_s20   ;;  %s706_s15 = smov %s545_s16 }
 0x128   : > { %p14_p10 = scmp.ge.s32.totalorder %s17_s20, 4   ;;  %s707_s16 = smov %s549_s17 }
 0x129   : > { %s708_s17 = smov %s641_s28  ;;  %s709_s18 = smov %s557_s19 }
 0x12a   : > { %s710_s19 = smov %s712_s23  ;;  %16 = sbr.rel (!%p14_p10) target bundleno = 4 (0x4), region = 78 }
 0x12f   :  { %344 = vsyncpa [#allocation3], 1 }
 0x130   :  { %346 = vsyncpa [#allocation3 + $0x1], 1 }

</bundles_post_ra>
